<compile_context>
chip_gen: v7x
topology: tpu7x:2x2x1
jax: 0.10.0
libtpu: 0.0.40
codegen_flags: <defaults>
</compile_context>

<pallas_src>
import functools
import math

import jax
import jax.numpy as jnp
from jax import lax
from jax.experimental import pallas as pl
from jax.experimental.pallas import tpu as pltpu


_LANE = 128


def _round_up(x, m):
    return ((x + m - 1) // m) * m


def _cdiv(a, b):
    return (a + b - 1) // b


def _vmem_capacity_bytes():
    """Per-TensorCore VMEM capacity; conservative (v7x-sized) fallback if unqueryable."""
    try:
        info = pltpu.get_tpu_info()
        cap = getattr(info, "vmem_capacity_bytes", None)
        if cap:
            return int(cap)
    except Exception:
        pass
    return 64 * 1024 * 1024


def _scoped_vmem_limit_bytes():
    cap = _vmem_capacity_bytes()
    # ~65% of capacity: ~41 MiB on v7x (64 MiB), ~83 MiB on v5e/v6e (128 MiB).
    return max(32 * 1024 * 1024, min(int(cap * 0.65), 96 * 1024 * 1024))


def _choose_tile_n(N, C, E_pad, x_isz, out_isz, w_isz, requested, vmem_limit):
    """Largest lane-multiple tile_n whose pipelined working set fits the scoped VMEM limit."""
    n_up = _round_up(N, _LANE)
    per_col = (
        2 * C * x_isz        # double-buffered input slab, per column
        + C * 2              # in-kernel bf16 cast copy of the slab (worst case)
        + 2 * E_pad * out_isz  # double-buffered output tile, per column
        + E_pad * 4          # f32 accumulator (+ bias add) temporary, per column
    )
    fixed = (
        2 * C * E_pad * w_isz   # double-buffered grid-invariant weight
        + 2 * E_pad * 4         # double-buffered f32 bias
        + 2 * 1024 * 1024       # Mosaic internal scratch headroom
    )
    budget_cols = max(_LANE, (vmem_limit - fixed) // per_col)
    tile = min(requested, budget_cols, n_up)
    tile = max(_LANE, (tile // _LANE) * _LANE)
    return min(tile, n_up)


def _mlp_proj_kernel(x_ref, w_ref, b_ref, o_ref, *, matmul_dtype):
    """One (tile_n, E_pad) output tile of  (x^T @ W + b)  with the NCHW transpose fused.

    x_ref : (C, tile_n)  column slab of one image in native (C, N) layout
    w_ref : (C, E_pad)   projection weight, already in the matmul dtype
    b_ref : (1, E_pad)   bias, float32
    o_ref : (tile_n, E_pad)
    """
    x = x_ref[...].astype(matmul_dtype)           # no-op when the producer feeds bf16
    acc = lax.dot_general(
        x, w_ref[...],
        dimension_numbers=(((0,), (0,)), ((), ())),   # contract over C (transposed-LHS matmul)
        preferred_element_type=jnp.float32,           # f32 accumulate on the MXU
    )
    o_ref[...] = (acc + b_ref[...]).astype(o_ref.dtype)   # f32 epilogue (safe on v5e VPU)


def prepare_proj_params(weight, bias, matmul_dtype=jnp.bfloat16):
    """One-time param transform: nn.Linear (E, C) weight -> (C, E_pad) in the matmul dtype,
    bias -> (1, E_pad) float32.  Store the result; avoids a transpose/pad pass per forward."""
    E, C = weight.shape
    E_pad = _round_up(E, _LANE)
    w = jnp.asarray(weight).T.astype(matmul_dtype)
    b = jnp.asarray(bias).astype(jnp.float32).reshape(1, E)
    if E_pad != E:
        w = jnp.pad(w, ((0, 0), (0, E_pad - E)))
        b = jnp.pad(b, ((0, 0), (0, E_pad - E)))
    return w, b, E


def mlp_forward_prepared(x_nchw, w_ce, b_1e, out_features, *, tile_n=2048):
    """SegFormer head MLP with pre-prepared params.

    x_nchw : (B, C, H, W)  (bf16 from the producer halves HBM traffic; f32 also fine)
    w_ce   : (C, E_pad)    from prepare_proj_params
    b_1e   : (1, E_pad)    float32, from prepare_proj_params
    returns: (B, H*W, out_features) in x_nchw.dtype
    """
    B, C, H, W = x_nchw.shape
    Cw, E_pad = w_ce.shape
    assert Cw == C, f"weight dim {Cw} != input channels {C}"
    N = H * W
    dtype = x_nchw.dtype
    x_isz = jnp.dtype(dtype).itemsize
    out_isz = x_isz
    w_isz = jnp.dtype(w_ce.dtype).itemsize

    # NCHW -> (B, C, N) is a free, contiguous reshape; NO wrapper transpose.
    x3 = x_nchw.reshape(B, C, N)

    vmem_limit = _scoped_vmem_limit_bytes()
    tile = _choose_tile_n(N, C, E_pad, x_isz, out_isz, w_isz, tile_n, vmem_limit)
    grid = (B, _cdiv(N, tile))   # ragged tail: OOB reads garbage / writes masked — safe,
                                 # output columns are independent and C is always full.

    cost = pl.CostEstimate(
        flops=2 * B * N * C * out_features,
        transcendentals=0,
        bytes_accessed=(B * N * C * x_isz + C * E_pad * w_isz
                        + B * N * E_pad * out_isz + E_pad * 4),
    )

    kernel = functools.partial(_mlp_proj_kernel, matmul_dtype=w_ce.dtype)

    out = pl.pallas_call(
        kernel,
        out_shape=jax.ShapeDtypeStruct((B, N, E_pad), dtype),
        grid_spec=pltpu.PrefetchScalarGridSpec(
            num_scalar_prefetch=0,
            grid=grid,
            in_specs=[
                # (C, tile) column slab of image b; the (1,2)-transpose is fused here.
                pl.BlockSpec((None, C, tile), lambda bb, i: (bb, 0, i)),
                # Grid-invariant weight / bias (tiny; default double-buffering is fine).
                pl.BlockSpec((C, E_pad), lambda bb, i: (0, 0)),
                pl.BlockSpec((1, E_pad), lambda bb, i: (0, 0)),
            ],
            out_specs=pl.BlockSpec((None, tile, E_pad), lambda bb, i: (bb, i, 0)),
        ),
        compiler_params=pltpu.CompilerParams(
            dimension_semantics=("parallel", "parallel"),
            vmem_limit_bytes=vmem_limit,
        ),
        cost_estimate=cost,
    )(x3, w_ce, b_1e)

    if E_pad != out_features:
        # Real SegFormer E (256/768) is already lane-aligned; only odd E pays this slice.
        out = out[..., :out_features]
    return out


def mlp_forward(x_nchw, weight, bias, *, matmul_dtype=jnp.bfloat16, tile_n=2048):
    """Convenience wrapper matching nn.Linear param layout: weight (E, C), bias (E,)."""
    w_ce, b_1e, e_out = prepare_proj_params(weight, bias, matmul_dtype=matmul_dtype)
    return mlp_forward_prepared(x_nchw, w_ce, b_1e, e_out, tile_n=tile_n)


def init_params(key, dim, embed_dim, dtype=jnp.float32):
    # Deterministic init mimicking nn.Linear defaults (uniform +-1/sqrt(dim)).
    kw, kb = jax.random.split(key)
    bound = 1.0 / math.sqrt(dim)
    weight = jax.random.uniform(kw, (embed_dim, dim), dtype, -bound, bound)
    bias = jax.random.uniform(kb, (embed_dim,), dtype, -bound, bound)
    return weight, bias


if __name__ == "__main__":
    def _reference(x, weight, bias):
        B, C, H, W = x.shape
        tokens = jnp.transpose(x.reshape(B, C, H * W).astype(jnp.float32), (0, 2, 1))
        return tokens @ weight.T.astype(jnp.float32) + bias.astype(jnp.float32)

    key = jax.random.PRNGKey(0)
    kx, kp, kx2 = jax.random.split(key, 3)

    # Spec-sized test: B=2, C=4, 16x16 spatial, embed_dim=32.
    B, C, H, W, E = 2, 4, 16, 16, 32
    x = jax.random.normal(kx, (B, C, H, W), jnp.float32)
    weight, bias = init_params(kp, C, E)
    ref = _reference(x, weight, bias)

    # 1) Exact f32-matmul path (prepared params), tight tolerance.
    w32, b32, e_out = prepare_proj_params(weight, bias, matmul_dtype=jnp.float32)
    out_f32 = jax.block_until_ready(mlp_forward_prepared(x, w32, b32, e_out))
    assert out_f32.shape == (B, H * W, E)
    assert jnp.allclose(out_f32, ref, atol=1e-5, rtol=1e-5)

    # 2) Default bf16-matmul path via the convenience wrapper (f32 activations, f32 accum).
    out_bf = jax.block_until_ready(mlp_forward(x, weight, bias))
    assert out_bf.shape == (B, H * W, E)
    assert jnp.allclose(out_bf, ref, atol=6e-2, rtol=6e-2)

    # 3) Producer-side bf16 activations (halves HBM traffic), bf16 params.
    wbf, bbf, _ = prepare_proj_params(weight, bias, matmul_dtype=jnp.bfloat16)
    out_act = jax.block_until_ready(
        mlp_forward_prepared(x.astype(jnp.bfloat16), wbf, bbf, e_out))
    assert out_act.shape == (B, H * W, E)
    assert jnp.allclose(out_act.astype(jnp.float32), ref, atol=1e-1, rtol=1e-1)

    # 4) Ragged spatial extent (H*W not lane-aligned), exact path, tight tolerance.
    x2 = jax.random.normal(kx2, (1, C, 5, 7), jnp.float32)
    out2 = jax.block_until_ready(mlp_forward_prepared(x2, w32, b32, e_out))
    assert out2.shape == (1, 35, E)
    assert jnp.allclose(out2, _reference(x2, weight, bias), atol=1e-5, rtol=1e-5)

    print("KERNEL_OK")
</pallas_src>

<mosaic_0001>
module attributes {stable_mosaic.version = 11 : i64} {
  func.func @_mlp_proj_kernel(%arg0: i32, %arg1: i32, %arg2: memref<1x4x256xf32, #tpu.memory_space<vmem>>, %arg3: memref<4x128xf32, #tpu.memory_space<vmem>>, %arg4: memref<1x128xf32, #tpu.memory_space<vmem>>, %arg5: memref<1x256x128xf32, #tpu.memory_space<vmem>>) attributes {dimension_semantics = [#tpu.dimension_semantics<parallel>, #tpu.dimension_semantics<parallel>], iteration_bounds = array<i64: 2, 1>, scalar_prefetch = 0 : i64, scratch_operands = 0 : i64, tpu.core_type = #tpu.core_type<tc>, window_params = [{transform_indices = @transform_0, window_bounds = array<i64: 1, 4, 256>}, {pipeline_mode = #tpu.pipeline_mode<synchronous>, transform_indices = @transform_1, window_bounds = array<i64: 4, 128>}, {pipeline_mode = #tpu.pipeline_mode<synchronous>, transform_indices = @transform_2, window_bounds = array<i64: 1, 128>}, {transform_indices = @transform_3, window_bounds = array<i64: 1, 256, 128>}]} {
    %c0 = arith.constant 0 : index
    %c0_0 = arith.constant 0 : index
    %c0_1 = arith.constant 0 : index
    %0 = vector.load %arg2[%c0, %c0_0, %c0_1] : memref<1x4x256xf32, #tpu.memory_space<vmem>>, vector<1x4x256xf32>
    %1 = vector.shape_cast %0 : vector<1x4x256xf32> to vector<4x256xf32>
    %c0_2 = arith.constant 0 : index
    %c0_3 = arith.constant 0 : index
    %2 = vector.load %arg3[%c0_2, %c0_3] : memref<4x128xf32, #tpu.memory_space<vmem>>, vector<4x128xf32>
    %cst = arith.constant dense<0.000000e+00> : vector<256x128xf32>
    %3 = tpu.matmul %1, %2, %cst {dimension_numbers = #tpu.dot_dimension_numbers<[0], [0], [1], [1], [0, 1, 1, 1], [], []>} : vector<4x256xf32>, vector<4x128xf32>, vector<256x128xf32> -> vector<256x128xf32>
    %c0_4 = arith.constant 0 : index
    %c0_5 = arith.constant 0 : index
    %4 = vector.load %arg4[%c0_4, %c0_5] : memref<1x128xf32, #tpu.memory_space<vmem>>, vector<1x128xf32>
    %5 = vector.broadcast %4 : vector<1x128xf32> to vector<256x128xf32>
    %6 = arith.addf %3, %5 : vector<256x128xf32>
    %c0_6 = arith.constant 0 : index
    %c0_7 = arith.constant 0 : index
    %c0_8 = arith.constant 0 : index
    %7 = vector.load %arg5[%c0_6, %c0_7, %c0_8] : memref<1x256x128xf32, #tpu.memory_space<vmem>>, vector<1x256x128xf32>
    %8 = vector.shape_cast %7 : vector<1x256x128xf32> to vector<256x128xf32>
    %9 = vector.shape_cast %6 : vector<256x128xf32> to vector<1x256x128xf32>
    tpu.vector_store %arg5[%c0_6, %c0_7, %c0_8], %9 {strides = array<i32>} : memref<1x256x128xf32, #tpu.memory_space<vmem>>, vector<1x256x128xf32>,
    return
  }
  func.func @transform_0(%arg0: i32, %arg1: i32) -> (i32, i32, i32) {
    %c0_i32 = arith.constant 0 : i32
    %c0_i32_0 = arith.constant 0 : i32
    return %arg0, %c0_i32, %arg1 : i32, i32, i32
  }
  func.func @transform_1(%arg0: i32, %arg1: i32) -> (i32, i32) {
    %c0_i32 = arith.constant 0 : i32
    %c0_i32_0 = arith.constant 0 : i32
    %c0_i32_1 = arith.constant 0 : i32
    return %c0_i32, %c0_i32_0 : i32, i32
  }
  func.func @transform_2(%arg0: i32, %arg1: i32) -> (i32, i32) {
    %c0_i32 = arith.constant 0 : i32
    %c0_i32_0 = arith.constant 0 : i32
    %c0_i32_1 = arith.constant 0 : i32
    return %c0_i32, %c0_i32_0 : i32, i32
  }
  func.func @transform_3(%arg0: i32, %arg1: i32) -> (i32, i32, i32) {
    %c0_i32 = arith.constant 0 : i32
    %c0_i32_0 = arith.constant 0 : i32
    return %arg0, %arg1, %c0_i32 : i32, i32, i32
  }
}

</mosaic_0001>

<bundles_post_ra>
// kernel: tpu_custom_call.1
= control target key start
LH: loop header
LB: loop body
LE: loop exit
PB: predicated region body
PF: predicated region fallthrough
CT: control target
= control target key end

     0   :  { %8 = vsyncpa [#allocation3], 0  ;;  %s1476_s0 = inlined_call_operand.hbm [shape: f32[2,4,256], index: 0, kind: input, shape index: {}]   ;;  %s1477_s1 = inlined_call_operand.hbm [shape: f32[4,128], index: 1, kind: input, shape index: {}]   ;;  %s1478_s2 = inlined_call_operand.vmem [shape: f32[1,128], index: 2, kind: input, shape index: {}]   ;;  %s1479_s3 = inlined_call_operand.hbm [shape: f32[2,256,128], index: 3, kind: output, shape index: {}]  }
   0x1   :  { %10 = vsyncpa [#allocation3 + $0x1], 0 }
   0x2   :  { %11 = vsyncpa [#allocation6], 0 }
   0x3   :  { %12 = vsyncpa [#allocation4], 0 }
   0x4   :  { %14 = vsyncpa [#allocation4 + $0x1], 0  ;;  %s1153_s12 = smov 0   ;;  %s1155_s13 = smov 0  }
   0x5   :  { %s1157_s14 = smov 0   ;;  %s1159_s15 = smov 0  }
   0x6   :  { %s1161_s16 = smov 0   ;;  %s1163_s17 = smov 0  }
   0x7 LB: > { %s767_s18 = sadd.s32 4294967295, %s1126_s17   ;;  %s768_s19 = sadd.s32 4294967294, %s1126_s17   ;;  %s1126_s17 = sphi %s1163_s17, %s20_s17   ;;  %s1122_s16 = sphi %s1161_s16, %s1504_s16   ;;  %s1118_s15 = sphi %s1159_s15, %s1503_s15   ;;  %s1114_s14 = sphi %s1157_s14, %s1502_s14   ;;  %s1110_s13 = sphi %s1155_s13, %s1501_s13   ;;  %s1106_s12 = sphi %s1153_s12, %s1500_s12  }
   0x8   : > { %p54_p0 = scmp.ne.s32.totalorder %s1110_s13, %s1106_s12  ;;  %p1187_p1 = scmp.eq.s32.totalorder %s767_s18, 0 }
   0x9   : > { %p1191_p2 = scmp.eq.s32.totalorder %s767_s18, 1  ;;  %p128_p3 = scmp.eq.s32.totalorder %s768_s19, 1 }
   0xa   : > { %s1484_s20 = scalar_select %p1187_p1, 1, 0 }
   0xb   : > { %s1485_s21 = scalar_select %p1191_p2, 1, 0 }
   0xc   : > { %p1197_p4 = por %p1187_p1, %p54_p0  ;;  %p769_p5 = scmp.ge.s32.totalorder %s1126_s17, 1 }
   0xd   : > { %p1202_p6 = por %p128_p3, %p54_p0  ;;  %p135_p7 = scmp.lt.s32.totalorder %s1126_s17, 3 }
   0xe   : > { %s1486_s22 = scalar_select %p1197_p4, 1, 0 }
   0xf   : > { %s1487_s23 = scalar_select %p1202_p6, 1, 0 }
  0x10   : > { %p1207_p8 = pnand %p769_p5, %p135_p7  ;;  %s1128_s25 = smov [#allocation5]  }
  0x11   : > { %s148_s26 = sshll.u32 %s1128_s25, 4  ;;  %s32_s28 = sadd.s32 1, %s1122_s16  ;;  %s149_s26 = int_to_ptr.vmem [resolvable:$true] %s148_s26 }
  0x12   : > { %s1488_s24 = scalar_select %p1207_p8, 1, 0 }
  0x13   : > { %p913_p10 = pneg %p1207_p8  ;;  %s41_s29 = sadd.s32 1, %s1114_s14 }
  0x14   : > { %p1222_p12 = scmp.ge.s32.totalorder %s32_s28, 2  ;;  %s982_s6 = scalar_lea.hbm %s1477_s1, 64 }
  0x15   : > { %p1216_p11 = pnand %p913_p10, %p1187_p1  ;;  %p983_p13 = scmp.ne.s32.totalorder %s1477_s1, %s982_s6 }
  0x16   : > { %s1490_s30 = scalar_select %p1222_p12, 1, 0 }
  0x17   : > { %p984_p0 = pneg %p1216_p11  ;;  %p989_p7 = scmp.lt.u32.totalorder %s982_s6, %s1477_s1 }
  0x19   : > { %p985_p3 = pnand %p984_p0, %p983_p13 }
  0x1b   : > { %p986_p5 = pneg %p985_p3 }
  0x1d   : > { %p991_p10 = pnand %p989_p7, %p986_p5 }
  0x1f   : > { %994 = shalt.err (!%p991_p10)
}
  0x20   : > { %s995_s11 = scalar_lea.vmem %s149_s26, 64  ;;  %p1003_p4 = scmp.lt.s32.totalorder %s149_s26, %s149_s26 }
  0x21   : > { %p996_p9 = scmp.ne.s32.totalorder %s149_s26, %s995_s11  ;;  %p1004_p8 = scmp.lt.s32.totalorder %s995_s11, %s995_s11 }
  0x23   : > { %p998_p6 = pnand %p996_p9, %p984_p0  ;;  %p1005_p2 = por %p1004_p8, %p1003_p4 }
  0x25   : > { %p999_p1 = pneg %p998_p6 }
  0x27   : > { %p1006_p12 = pnand %p1005_p2, %p999_p1 }
  0x29   : > { %1009 = shalt.err (!%p1006_p12)
}
  0x2a   : > { %916 = dma.hbm_to_vmem [thread:$0]  (!%p1216_p11), %s1477_s1, 64, %s149_s26, [#allocation6]  }
  0x2b   : > { %p1491_p4 = scmp.ne.s32.totalorder %s1490_s30, 0  ;;  %p48_p1 = scmp.ne.s32.totalorder %s1114_s14, %s1110_s13 }
  0x2c   : > { %p49_p2 = scmp.eq.s32.totalorder %s1126_s17, 0  ;;  %p926_p6 = scmp.lt.s32.totalorder %s1126_s17, 2 }
  0x2d   : > { %s1506_s28 = smov (%p1491_p4, %s32_s28), 0  ;;  %p1492_p12 = scmp.ne.s32.totalorder %s1485_s21, 0 }
  0x2e   : > { %s36_s25 = ssub.s32 %s1122_s16, %s1506_s28  ;;  %p50_p9 = por %p49_p2, %p48_p1 }
  0x2f   : > { %p39_p8 = scmp.eq.s32.totalorder %s36_s25, 0  ;;  %p1254_p13 = por %p1492_p12, %p48_p1 }
  0x30   : > { %s162_s4 = sand.u32 1, %s1114_s14   ;;  %s818_s30 = sshll.u32 %s1122_s16, 7 }
  0x31   : > { %s1262_s5 = scalar_select %p39_p8, %s1114_s14, %s41_s29  }
  0x32   : > { %s772_s26 = sshll.u32 %s162_s4, 3  ;;  %s1268_s8 = scalar_lea.hbm %s1476_s0, %s818_s30 }
  0x33   : > { %s166_s21 = scalar_lea.vmem [#allocation2], %s772_s26  ;;  %p1272_p11 = pnand %p926_p6, %p50_p9 }
  0x34   : > { %s176_s9 = sshll.u32 %s166_s21, 4  ;;  %s163_s29 = scalar_lea.sflag [#allocation3], %s162_s4  ;;  %s1270_s9 = int_to_ptr.vmem [resolvable:$true] %s176_s9 }
  0x35   : > { %s1010_s11 = scalar_lea.hbm %s1268_s8, 128  ;;  %p1012_p3 = pneg %p1272_p11 }
  0x36   : > { %p1011_p0 = scmp.ne.s32.totalorder %s1268_s8, %s1010_s11  ;;  %s1015_s25 = scalar_lea.hbm %s1476_s0, 256 }
  0x37   : > { %p1016_p10 = scmp.lt.u32.totalorder %s1268_s8, %s1476_s0  ;;  %p1017_p4 = scmp.lt.u32.totalorder %s1015_s25, %s1010_s11 }
  0x38   : > { %p1013_p5 = pnand %p1012_p3, %p1011_p0  ;;  %p1019_p2 = scmp.lt.u32.totalorder %s1010_s11, %s1268_s8 }
  0x39   : > { %p1018_p1 = por %p1017_p4, %p1016_p10 }
  0x3a   : > { %p1014_p7 = pneg %p1013_p5 }
  0x3b   : > { %p1020_p6 = por %p1019_p2, %p1018_p1 }
  0x3d   : > { %p1021_p8 = pnand %p1020_p6, %p1014_p7 }
  0x3f   : > { %1024 = shalt.err (!%p1021_p8)
}
  0x40   : > { %s1025_s4 = scalar_lea.vmem %s1270_s9, 128  ;;  %s1129_s6 = smov [#allocation2]  }
  0x41   : > { %p1026_p9 = scmp.ne.s32.totalorder %s1270_s9, %s1025_s4  ;;  %s1030_s7 = sshll.u32 %s1129_s6, 4  ;;  %s1031_s7 = int_to_ptr.vmem [resolvable:$false] %s1030_s7 }
  0x42   : > { %s1032_s21 = scalar_lea.vmem %s1031_s7, 256  ;;  %p1033_p5 = scmp.lt.s32.totalorder %s1270_s9, %s1031_s7 }
  0x43   : > { %p1028_p12 = pnand %p1026_p9, %p1012_p3  ;;  %p1034_p10 = scmp.lt.s32.totalorder %s1032_s21, %s1025_s4 }
  0x45   : > { %p1029_p0 = pneg %p1028_p12  ;;  %p1035_p4 = por %p1034_p10, %p1033_p5 }
  0x47   : > { %p1036_p1 = pnand %p1035_p4, %p1029_p0 }
  0x49   : > { %1039 = shalt.err (!%p1036_p1)
}
  0x4a   : > { %920 = dma.hbm_to_vmem [thread:$0]  (!%p1272_p11), %s1268_s8, 128, %s1270_s9, %s163_s29  }
  0x4b   : > { %p1495_p7 = scmp.ne.s32.totalorder %s1488_s24, 0 }
  0x4c   : > { %s1304_s11 = sand.u32 (!%p1495_p7), 1, %s1110_s13   ;;  %p1496_p3 = scmp.ne.s32.totalorder (!%p1495_p7), %s1486_s22, 0 }
  0x4d   : > { %185 = sbr.rel (%p1495_p7) target bundleno = 572 (0x23c), region = 32  ;;  %s776_s18 = sshll.u32 (!%p1495_p7), %s1304_s11, 3 }
  0x4e   : > { %s188_s19 = scalar_lea.sflag (!%p1495_p7), [#allocation3], %s1304_s11  ;;  %s191_s25 = scalar_lea.vmem (!%p1495_p7), [#allocation2], %s776_s18 }
  0x54   : > { %1093 = dma.done.wait (%p1496_p3), %s188_s19, 128  }
  0x55   : > { %1095 = vsyncadd (%p1496_p3), %s188_s19, 4294967168  ;;  %p1497_p2 = scmp.ne.s32.totalorder %s1484_s20, 0 }
  0x57   : > { %1097 = dma.done.wait (%p1497_p2), [#allocation6], 64  }
  0x58   : > { %1099 = vsyncadd (%p1497_p2), [#allocation6], 4294967232  ;;  %v220_v0 = vld [vmem:[%s191_s25] sm:$0xff]  ;;  %v221_v1 = vld [vmem:[#allocation5] sm:$0xf]  ;;  %vm393_vm0 = vcmask 1043456  }
  0x59   : > { %232 = vxpose.xlu0.b32.start.end [1/1] (short) %v220_v0, 128  ;;  %853 = vmatprep.subr.msk.mxu0 %vm393_vm0, %v221_v1  ;;  %v230_v2 = vcombine.high %v220_v0, %v220_v0  ;;  %vm296_vm1 = vcmask 31744   ;;  %s778_s20 = sshll.u32 %s1304_s11, 8  ;;  %v1352_v35 = vld [vmem:[%s1478_s2] ss:$0 sm:$0xff]  ;;  %s819_s9 = sshll.u32 %s1118_s15, 12 }
  0x5a   : > { %903 = vmatprep.subr.msk.mxu1 %vm393_vm0, %v221_v1  ;;  %854 = vmatpush3.msk.msra.mxu0 %vm393_vm0, %v221_v1  ;;  %s1356_s8 = scalar_lea.vmem [#allocation7], %s778_s20  ;;  %s1422_s30 = scalar_lea.hbm %s1479_s3, %s819_s9 }
  0x5b   : > { %904 = vmatpush3.msk.msra.mxu1 %vm393_vm0, %v221_v1  ;;  %s670_s10 = sshll.u32 %s1356_s8, 4  ;;  %s655_s15 = scalar_lea.sflag [#allocation4], %s1304_s11  ;;  %s1424_s10 = int_to_ptr.vmem [resolvable:$true] %s670_s10 }
  0x5c   : > { %s1040_s4 = scalar_lea.vmem %s1424_s10, 4096  ;;  %s1130_s6 = smov [#allocation7]  }
  0x5d   : > { %p1041_p11 = scmp.ne.s32.totalorder %s1424_s10, %s1040_s4  ;;  %s1044_s7 = sshll.u32 %s1130_s6, 4  ;;  %s1045_s7 = int_to_ptr.vmem [resolvable:$false] %s1044_s7 }
  0x5e   : > { %s1046_s21 = scalar_lea.vmem %s1045_s7, 8192  ;;  %p1047_p9 = scmp.lt.s32.totalorder %s1424_s10, %s1045_s7 }
  0x5f   : > { %p1042_p6 = pnand %p1041_p11, %p1254_p13  ;;  %p1048_p12 = scmp.lt.s32.totalorder %s1046_s21, %s1040_s4 }
  0x61   : > { %p1043_p8 = pneg %p1042_p6  ;;  %p1049_p0 = por %p1048_p12, %p1047_p9 }
  0x63   : > { %p1050_p5 = pnand %p1049_p0, %p1043_p8 }
  0x96   : > { %264 = vxpose.xlu0.b32.start.end [1/1] (short) %v230_v2, 128 }
  0xd9   : > { %v248_v3 = vpop.trf.xlu0 }
  0xda   : > { %855 = vmatprep.mubr.msk.f32.mxu0 %vm296_vm1, %v248_v3 }
  0xdd   : > { %v249_v4 = vpop.trf.xlu0 }
  0xde   : > { %856 = vmatmul.mubr.msk.f32.vlgmr.msra.gmra.mrb[0].mxu0 %vm296_vm1, %v249_v4 }
  0xe1   : > { %v250_v5 = vpop.trf.xlu0 }
  0xe2   : > { %858 = vmatprep.mubr.msk.f32.mxu0 %vm296_vm1, %v250_v5 }
  0xe5   : > { %v251_v6 = vpop.trf.xlu0 }
  0xe6   : > { %859 = vmatmul.mubr.msk.f32.gmra.mrb[2].mxu0 %vm296_vm1, %v251_v6 }
  0xe9   : > { %v252_v7 = vpop.trf.xlu0 }
  0xea   : > { %861 = vmatprep.mubr.msk.f32.mxu0 %vm296_vm1, %v252_v7 }
  0xed   : > { %v253_v8 = vpop.trf.xlu0 }
  0xee   : > { %862 = vmatmul.mubr.msk.f32.gmra.mrb[4].mxu0 %vm296_vm1, %v253_v8 }
  0xf1   : > { %v254_v9 = vpop.trf.xlu0 }
  0xf2   : > { %864 = vmatprep.mubr.msk.f32.mxu0 %vm296_vm1, %v254_v9 }
  0xf5   : > { %v255_v10 = vpop.trf.xlu0 }
  0xf6   : > { %865 = vmatmul.mubr.msk.f32.gmra.mrb[6].mxu0 %vm296_vm1, %v255_v10 }
  0xf9   : > { %v256_v11 = vpop.trf.xlu0 }
  0xfa   : > { %867 = vmatprep.mubr.msk.f32.mxu0 %vm296_vm1, %v256_v11 }
  0xfd   : > { %v257_v12 = vpop.trf.xlu0 }
  0xfe   : > { %868 = vmatmul.mubr.msk.f32.gmra.mrb[8].mxu0 %vm296_vm1, %v257_v12 }
 0x101   : > { %v258_v13 = vpop.trf.xlu0 }
 0x102   : > { %870 = vmatprep.mubr.msk.f32.mxu0 %vm296_vm1, %v258_v13 }
 0x105   : > { %v259_v14 = vpop.trf.xlu0 }
 0x106   : > { %871 = vmatmul.mubr.msk.f32.gmra.mrb[10].mxu0 %vm296_vm1, %v259_v14 }
 0x109   : > { %v260_v15 = vpop.trf.xlu0 }
 0x10a   : > { %873 = vmatprep.mubr.msk.f32.mxu0 %vm296_vm1, %v260_v15 }
 0x10d   : > { %v261_v16 = vpop.trf.xlu0 }
 0x10e   : > { %874 = vmatmul.mubr.msk.f32.gmra.mrb[12].mxu0 %vm296_vm1, %v261_v16 }
 0x111   : > { %v262_v17 = vpop.trf.xlu0 }
 0x112   : > { %876 = vmatprep.mubr.msk.f32.mxu0 %vm296_vm1, %v262_v17 }
 0x115   : > { %v263_v18 = vpop.trf.xlu0 }
 0x116   : > { %877 = vmatmul.mubr.msk.f32.gmra.mrb[14].mxu0 %vm296_vm1, %v263_v18 }
 0x119   : > { %v280_v19 = vpop.trf.xlu0 }
 0x11a   : > { %879 = vmatprep.mubr.msk.f32.mxu1 %vm296_vm1, %v280_v19 }
 0x11d   : > { %v281_v20 = vpop.trf.xlu0 }
 0x11e   : > { %880 = vmatmul.mubr.msk.f32.vlgmr.msra.gmra.mrb[0].mxu1 %vm296_vm1, %v281_v20 }
 0x121   : > { %v282_v21 = vpop.trf.xlu0 }
 0x122   : > { %882 = vmatprep.mubr.msk.f32.mxu1 %vm296_vm1, %v282_v21 }
 0x125   : > { %v283_v22 = vpop.trf.xlu0 }
 0x126   : > { %883 = vmatmul.mubr.msk.f32.gmra.mrb[2].mxu1 %vm296_vm1, %v283_v22 }
 0x129   : > { %v284_v23 = vpop.trf.xlu0 }
 0x12a   : > { %885 = vmatprep.mubr.msk.f32.mxu1 %vm296_vm1, %v284_v23 }
 0x12d   : > { %v285_v24 = vpop.trf.xlu0 }
 0x12e   : > { %886 = vmatmul.mubr.msk.f32.gmra.mrb[4].mxu1 %vm296_vm1, %v285_v24 }
 0x131   : > { %v286_v25 = vpop.trf.xlu0 }
 0x132   : > { %888 = vmatprep.mubr.msk.f32.mxu1 %vm296_vm1, %v286_v25 }
 0x135   : > { %v287_v26 = vpop.trf.xlu0 }
 0x136   : > { %889 = vmatmul.mubr.msk.f32.gmra.mrb[6].mxu1 %vm296_vm1, %v287_v26 }
 0x139   : > { %v288_v27 = vpop.trf.xlu0 }
 0x13a   : > { %891 = vmatprep.mubr.msk.f32.mxu1 %vm296_vm1, %v288_v27 }
 0x13d   : > { %v289_v28 = vpop.trf.xlu0 }
 0x13e   : > { %892 = vmatmul.mubr.msk.f32.gmra.mrb[8].mxu1 %vm296_vm1, %v289_v28 }
 0x141   : > { %v290_v29 = vpop.trf.xlu0 }
 0x142   : > { %894 = vmatprep.mubr.msk.f32.mxu1 %vm296_vm1, %v290_v29 }
 0x145   : > { %v291_v30 = vpop.trf.xlu0 }
 0x146   : > { %895 = vmatmul.mubr.msk.f32.gmra.mrb[10].mxu1 %vm296_vm1, %v291_v30 }
 0x149   : > { %v292_v31 = vpop.trf.xlu0 }
 0x14a   : > { %897 = vmatprep.mubr.msk.f32.mxu1 %vm296_vm1, %v292_v31 }
 0x14d   : > { %v293_v32 = vpop.trf.xlu0 }
 0x14e   : > { %898 = vmatmul.mubr.msk.f32.gmra.mrb[12].mxu1 %vm296_vm1, %v293_v32 }
 0x151   : > { %v294_v33 = vpop.trf.xlu0 }
 0x152   : > { %900 = vmatprep.mubr.msk.f32.mxu1 %vm296_vm1, %v294_v33 }
 0x155   : > { %v295_v34 = vpop.trf.xlu0 }
 0x156   : > { %901 = vmatmul.mubr.msk.f32.gmra.mrb[14].mxu1 %vm296_vm1, %v295_v34 }
 0x1b1   : > { %v857_v36 = vpop.f32.mrb[0].mxu0 }
 0x1b2   : > { %v469_v37 = vadd.f32 %v857_v36, %v1352_v35  ;;  %v463_v38 = vpop.f32.mrb[1].mxu0 }
 0x1b3   : > { %v464_v39 = vadd.f32 %v1352_v35, %v463_v38 }
 0x1b4   : > { %623 = vst [vmem:[%s1356_s8 + $0x8] sm:$0xff] %v469_v37 }
 0x1b5   : > { %622 = vst [vmem:[%s1356_s8] sm:$0xff] %v464_v39 }
 0x1b9   : > { %v860_v40 = vpop.f32.mrb[2].mxu0 }
 0x1ba   : > { %v479_v41 = vadd.f32 %v860_v40, %v1352_v35  ;;  %v473_v42 = vpop.f32.mrb[3].mxu0 }
 0x1bb   : > { %v474_v43 = vadd.f32 %v1352_v35, %v473_v42 }
 0x1bc   : > { %625 = vst [vmem:[%s1356_s8 + $0x18] sm:$0xff] %v479_v41 }
 0x1bd   : > { %624 = vst [vmem:[%s1356_s8 + $0x10] sm:$0xff] %v474_v43 }
 0x1c1   : > { %v863_v44 = vpop.f32.mrb[4].mxu0 }
 0x1c2   : > { %v489_v45 = vadd.f32 %v863_v44, %v1352_v35  ;;  %v483_v46 = vpop.f32.mrb[5].mxu0 }
 0x1c3   : > { %v484_v47 = vadd.f32 %v1352_v35, %v483_v46 }
 0x1c4   : > { %627 = vst [vmem:[%s1356_s8 + $0x28] sm:$0xff] %v489_v45 }
 0x1c5   : > { %626 = vst [vmem:[%s1356_s8 + $0x20] sm:$0xff] %v484_v47 }
 0x1c9   : > { %v866_v48 = vpop.f32.mrb[6].mxu0 }
 0x1ca   : > { %v499_v49 = vadd.f32 %v866_v48, %v1352_v35  ;;  %v493_v50 = vpop.f32.mrb[7].mxu0 }
 0x1cb   : > { %v494_v51 = vadd.f32 %v1352_v35, %v493_v50 }
 0x1cc   : > { %629 = vst [vmem:[%s1356_s8 + $0x38] sm:$0xff] %v499_v49 }
 0x1cd   : > { %628 = vst [vmem:[%s1356_s8 + $0x30] sm:$0xff] %v494_v51 }
 0x1d1   : > { %v869_v52 = vpop.f32.mrb[8].mxu0 }
 0x1d2   : > { %v509_v53 = vadd.f32 %v869_v52, %v1352_v35  ;;  %v503_v54 = vpop.f32.mrb[9].mxu0 }
 0x1d3   : > { %v504_v55 = vadd.f32 %v1352_v35, %v503_v54 }
 0x1d4   : > { %631 = vst [vmem:[%s1356_s8 + $0x48] sm:$0xff] %v509_v53 }
 0x1d5   : > { %630 = vst [vmem:[%s1356_s8 + $0x40] sm:$0xff] %v504_v55 }
 0x1d9   : > { %v872_v56 = vpop.f32.mrb[10].mxu0 }
 0x1da   : > { %v519_v57 = vadd.f32 %v872_v56, %v1352_v35  ;;  %v513_v58 = vpop.f32.mrb[11].mxu0 }
 0x1db   : > { %v514_v59 = vadd.f32 %v1352_v35, %v513_v58 }
 0x1dc   : > { %633 = vst [vmem:[%s1356_s8 + $0x58] sm:$0xff] %v519_v57 }
 0x1dd   : > { %632 = vst [vmem:[%s1356_s8 + $0x50] sm:$0xff] %v514_v59 }
 0x1e1   : > { %v875_v60 = vpop.f32.mrb[12].mxu0 }
 0x1e2   : > { %v529_v61 = vadd.f32 %v875_v60, %v1352_v35  ;;  %v523_v62 = vpop.f32.mrb[13].mxu0 }
 0x1e3   : > { %v524_v63 = vadd.f32 %v1352_v35, %v523_v62 }
 0x1e4   : > { %635 = vst [vmem:[%s1356_s8 + $0x68] sm:$0xff] %v529_v61 }
 0x1e5   : > { %634 = vst [vmem:[%s1356_s8 + $0x60] sm:$0xff] %v524_v63 }
 0x1e9   : > { %v878_v0 = vpop.f32.mrb[14].mxu0 }
 0x1ea   : > { %v539_v1 = vadd.f32 %v878_v0, %v1352_v35  ;;  %v533_v2 = vpop.f32.mrb[15].mxu0 }
 0x1eb   : > { %v534_v3 = vadd.f32 %v1352_v35, %v533_v2 }
 0x1ec   : > { %637 = vst [vmem:[%s1356_s8 + $0x78] sm:$0xff] %v539_v1 }
 0x1ed   : > { %636 = vst [vmem:[%s1356_s8 + $0x70] sm:$0xff] %v534_v3 }
 0x1f1   : > { %v881_v4 = vpop.f32.mrb[0].mxu1 }
 0x1f2   : > { %v549_v5 = vadd.f32 %v881_v4, %v1352_v35  ;;  %v543_v6 = vpop.f32.mrb[1].mxu1 }
 0x1f3   : > { %v544_v7 = vadd.f32 %v1352_v35, %v543_v6 }
 0x1f4   : > { %639 = vst [vmem:[%s1356_s8 + $0x88] sm:$0xff] %v549_v5 }
 0x1f5   : > { %638 = vst [vmem:[%s1356_s8 + $0x80] sm:$0xff] %v544_v7 }
 0x1f9   : > { %v884_v8 = vpop.f32.mrb[2].mxu1 }
 0x1fa   : > { %v559_v9 = vadd.f32 %v884_v8, %v1352_v35  ;;  %v553_v10 = vpop.f32.mrb[3].mxu1 }
 0x1fb   : > { %v554_v11 = vadd.f32 %v1352_v35, %v553_v10 }
 0x1fc   : > { %641 = vst [vmem:[%s1356_s8 + $0x98] sm:$0xff] %v559_v9 }
 0x1fd   : > { %640 = vst [vmem:[%s1356_s8 + $0x90] sm:$0xff] %v554_v11 }
 0x201   : > { %v887_v12 = vpop.f32.mrb[4].mxu1 }
 0x202   : > { %v569_v13 = vadd.f32 %v887_v12, %v1352_v35  ;;  %v563_v14 = vpop.f32.mrb[5].mxu1 }
 0x203   : > { %v564_v15 = vadd.f32 %v1352_v35, %v563_v14 }
 0x204   : > { %643 = vst [vmem:[%s1356_s8 + $0xa8] sm:$0xff] %v569_v13 }
 0x205   : > { %642 = vst [vmem:[%s1356_s8 + $0xa0] sm:$0xff] %v564_v15 }
 0x209   : > { %v890_v16 = vpop.f32.mrb[6].mxu1 }
 0x20a   : > { %v579_v17 = vadd.f32 %v890_v16, %v1352_v35  ;;  %v573_v18 = vpop.f32.mrb[7].mxu1 }
 0x20b   : > { %v574_v19 = vadd.f32 %v1352_v35, %v573_v18 }
 0x20c   : > { %645 = vst [vmem:[%s1356_s8 + $0xb8] sm:$0xff] %v579_v17 }
 0x20d   : > { %644 = vst [vmem:[%s1356_s8 + $0xb0] sm:$0xff] %v574_v19 }
 0x211   : > { %v893_v20 = vpop.f32.mrb[8].mxu1 }
 0x212   : > { %v589_v21 = vadd.f32 %v893_v20, %v1352_v35  ;;  %v583_v22 = vpop.f32.mrb[9].mxu1 }
 0x213   : > { %v584_v23 = vadd.f32 %v1352_v35, %v583_v22 }
 0x214   : > { %647 = vst [vmem:[%s1356_s8 + $0xc8] sm:$0xff] %v589_v21 }
 0x215   : > { %646 = vst [vmem:[%s1356_s8 + $0xc0] sm:$0xff] %v584_v23 }
 0x219   : > { %v896_v24 = vpop.f32.mrb[10].mxu1 }
 0x21a   : > { %v599_v25 = vadd.f32 %v896_v24, %v1352_v35  ;;  %v593_v26 = vpop.f32.mrb[11].mxu1 }
 0x21b   : > { %v594_v27 = vadd.f32 %v1352_v35, %v593_v26 }
 0x21c   : > { %649 = vst [vmem:[%s1356_s8 + $0xd8] sm:$0xff] %v599_v25 }
 0x21d   : > { %648 = vst [vmem:[%s1356_s8 + $0xd0] sm:$0xff] %v594_v27 }
 0x221   : > { %v899_v28 = vpop.f32.mrb[12].mxu1 }
 0x222   : > { %v609_v29 = vadd.f32 %v899_v28, %v1352_v35  ;;  %v603_v30 = vpop.f32.mrb[13].mxu1 }
 0x223   : > { %v604_v31 = vadd.f32 %v1352_v35, %v603_v30 }
 0x224   : > { %651 = vst [vmem:[%s1356_s8 + $0xe8] sm:$0xff] %v609_v29 }
 0x225   : > { %650 = vst [vmem:[%s1356_s8 + $0xe0] sm:$0xff] %v604_v31 }
 0x229   : > { %v902_v32 = vpop.f32.mrb[14].mxu1 }
 0x22a   : > { %v619_v33 = vadd.f32 %v902_v32, %v1352_v35  ;;  %v613_v34 = vpop.f32.mrb[15].mxu1 }
 0x22b   : > { %v614_v36 = vadd.f32 %v1352_v35, %v613_v34 }
 0x22c   : > { %653 = vst [vmem:[%s1356_s8 + $0xf8] sm:$0xff] %v619_v33 }
 0x22d   : > { %652 = vst [vmem:[%s1356_s8 + $0xf0] sm:$0xff] %v614_v36 }
 0x22e   : > { %1053 = shalt.err (!%p1050_p5)
}
 0x22f   : > { %s1054_s18 = scalar_lea.hbm %s1422_s30, 4096  ;;  %s1058_s20 = scalar_lea.hbm %s1479_s3, 8192 }
 0x230   : > { %p1055_p10 = scmp.ne.s32.totalorder %s1422_s30, %s1054_s18  ;;  %p1059_p7 = scmp.lt.u32.totalorder %s1422_s30, %s1479_s3 }
 0x231   : > { %p1060_p3 = scmp.lt.u32.totalorder %s1058_s20, %s1054_s18  ;;  %p1062_p11 = scmp.lt.u32.totalorder %s1054_s18, %s1422_s30 }
 0x232   : > { %p1056_p4 = pnand %p1055_p10, %p1254_p13 }
 0x233   : > { %p1061_p2 = por %p1060_p3, %p1059_p7 }
 0x234   : > { %p1057_p1 = pneg %p1056_p4 }
 0x235   : > { %p1063_p6 = por %p1062_p11, %p1061_p2 }
 0x237   : > { %p1064_p8 = pnand %p1063_p6, %p1057_p1 }
 0x239   : > { %1067 = shalt.err (!%p1064_p8)
}
 0x23a   : > { %s1131_s8 = smov 128   ;;  %s1132_s9 = smov 8  }
 0x23b   : > { %911 = dma.vmem_to_hbm [thread:$0]  (%p1254_p13), %s1424_s10, 4096, %s1422_s30, %s655_s15, %s1131_s8, %s1131_s8, %s1132_s9  }
 0x23c PF: > { %s685_s29 = sand.u32 1, %s1106_s12   ;;  %p1498_p9 = scmp.ne.s32.totalorder %s1487_s23, 0 }
 0x23d   : > { %p1499_p12 = scmp.ge.s32.totalorder %s1126_s17, 2  ;;  %s686_s26 = scalar_lea.sflag [#allocation4], %s685_s29 }
 0x23f   : > { %p922_p0 = pnand %p1499_p12, %p1498_p9 }
 0x241   : > { %1101 = dma.done.wait (!%p922_p0), %s686_s26, 4096  }
 0x242   : > { %1103 = vsyncadd (!%p922_p0), %s686_s26, 4294963200  ;;  %s20_s17 = sadd.s32 1, %s1126_s17   ;;  %s1500_s12 = smov %s1110_s13 }
 0x243   : > { %p17_p5 = scmp.ge.s32.totalorder %s20_s17, 4   ;;  %s1501_s13 = smov %s1114_s14 }
 0x244   : > { %s1502_s14 = smov %s1262_s5  ;;  %s1503_s15 = smov %s1122_s16 }
 0x245   : > { %s1504_s16 = smov %s1506_s28  ;;  %19 = sbr.rel (!%p17_p5) target bundleno = 7 (0x7), region = 81 }
 0x24c   :  { %691 = vsyncpa [#allocation3], 1 }
 0x24d   :  { %693 = vsyncpa [#allocation3 + $0x1], 1 }
 0x24e   :  { %694 = vsyncpa [#allocation6], 1 }
 0x24f   :  { %695 = vsyncpa [#allocation4], 1 }
 0x250   :  { %697 = vsyncpa [#allocation4 + $0x1], 1 }

</bundles_post_ra>
